<compile_context>
chip_gen: v7x
topology: tpu7x:2x2x1
jax: 0.10.0
libtpu: 0.0.40
codegen_flags: <defaults>
</compile_context>

<pallas_src>
import functools

import jax
import jax.numpy as jnp
from jax.experimental import pallas as pl
from jax.experimental.pallas import tpu as pltpu


def _round_up(x, m):
    return (x + m - 1) // m * m


def policy_net_kernel(x_ref, p_ref, o_ref, *, p_dim, r_b1, r_w2, r_b2):
    """One batch tile: Linear -> ReLU -> Linear -> softmax on lane-padded tiles.

    x_ref: (TB, S) input tile.
    p_ref: (rows, P) packed parameter slab (grid-invariant, DMA'd once):
           rows [0, S)            -> w1, lane-padded to P
           row  r_b1              -> b1, lane-padded with zeros
           rows [r_w2, r_w2 + P)  -> w2, rows >= H and lanes >= A are zero
           row  r_b2              -> b2, padded action lanes hold -1e30
    o_ref: (TB, P) lane-dense padded output (wrapper slices [:, :A]).
    """
    s_dim = x_ref.shape[1]
    x = x_ref[...].astype(jnp.float32)                       # (TB, S)

    # Layer 1 (kept on the MXU: K=S is tiny so the pass is cheap, and this
    # lowering is robust across v5e/v6e/v7x; the dominant fixed costs fixed
    # here were the 5 tiny DMAs and the 2-lane masked output store).
    h = jnp.dot(x, p_ref[0:s_dim, :], preferred_element_type=jnp.float32)
    h = h + p_ref[r_b1:r_b1 + 1, :]                          # (TB, P) + (1, P)
    h = jnp.maximum(h, 0.0)                                  # ReLU; padded lanes stay 0

    # Layer 2 on the MXU with a full 128-lane-wide operand.
    logits = jnp.dot(h, p_ref[r_w2:r_w2 + p_dim, :],
                     preferred_element_type=jnp.float32)     # (TB, P)
    logits = logits + p_ref[r_b2:r_b2 + 1, :]                # padded lanes -> -1e30

    # Numerically stable softmax over the action (lane) axis.  Padded lanes are
    # exactly -1e30, so exp(-1e30 - m) underflows to 0 and they contribute
    # nothing to the denominator.
    m = jnp.max(logits, axis=-1, keepdims=True)
    e = jnp.exp(logits - m)
    o_ref[...] = (e / jnp.sum(e, axis=-1, keepdims=True)).astype(o_ref.dtype)


@functools.partial(jax.jit, static_argnames=("batch_tile",))
def policy_net_forward(s, w1, b1, w2, b2, batch_tile=512):
    B, S = s.shape
    H = w1.shape[1]
    A = w2.shape[1]

    # Lane padding: both hidden and action dims padded to the same width P so
    # every in-kernel slice of the slab is full lane width.
    P = max(_round_up(H, 128), _round_up(A, 128))
    r_b1 = _round_up(S, 8)          # 8-row-aligned section offsets
    r_w2 = r_b1 + 8
    r_b2 = r_w2 + P
    rows = _round_up(r_b2 + 1, 8)

    # Pack all parameters into ONE slab -> a single HBM->VMEM DMA per call.
    slab = jnp.zeros((rows, P), jnp.float32)
    slab = slab.at[:S, :H].set(w1.astype(jnp.float32))
    slab = slab.at[r_b1, :H].set(b1.reshape(-1).astype(jnp.float32))
    slab = slab.at[r_w2:r_w2 + H, :A].set(w2.astype(jnp.float32))
    b2_row = jnp.full((P,), -1e30, jnp.float32).at[:A].set(
        b2.reshape(-1).astype(jnp.float32))
    slab = slab.at[r_b2, :].set(b2_row)

    # Batch grid: VMEM-safe tile (<=512 rows works on v5e/v6e/v7x), padded batch.
    tb = min(_round_up(batch_tile, 8), _round_up(B, 8))
    b_pad = _round_up(B, tb)
    x = s.astype(jnp.float32)
    if b_pad != B:
        x = jnp.pad(x, ((0, b_pad - B), (0, 0)))

    kernel = functools.partial(policy_net_kernel,
                               p_dim=P, r_b1=r_b1, r_w2=r_w2, r_b2=r_b2)
    out_padded = pl.pallas_call(
        kernel,
        out_shape=jax.ShapeDtypeStruct((b_pad, P), jnp.float32),
        grid=(b_pad // tb,),
        in_specs=[
            pl.BlockSpec((tb, S), lambda i: (i, 0)),       # batch-tiled input
            pl.BlockSpec((rows, P), lambda i: (0, 0)),     # grid-invariant params
        ],
        out_specs=pl.BlockSpec((tb, P), lambda i: (i, 0)),  # lane-dense store
        compiler_params=pltpu.CompilerParams(
            dimension_semantics=("parallel",),              # shard batch on v7x's 2 TCs
            vmem_limit_bytes=48 * 1024 * 1024,              # headroom, < v7x 64 MiB
        ),
    )(x, slab)

    # Strip batch padding and the padded action lanes.
    return out_padded[:B, :A]


def init_params(key, state_dim, hidden_dim, action_dim):
    """Deterministic init mimicking nn.Linear default uniform(-1/sqrt(in), 1/sqrt(in))."""
    k1, k2, k3, k4 = jax.random.split(key, 4)
    bound1 = 1.0 / jnp.sqrt(state_dim)
    bound2 = 1.0 / jnp.sqrt(hidden_dim)
    # Stored as (in, out) == transpose of PyTorch's (out, in) weight layout.
    w1 = jax.random.uniform(k1, (state_dim, hidden_dim), jnp.float32, -bound1, bound1)
    b1 = jax.random.uniform(k2, (1, hidden_dim), jnp.float32, -bound1, bound1)
    w2 = jax.random.uniform(k3, (hidden_dim, action_dim), jnp.float32, -bound2, bound2)
    b2 = jax.random.uniform(k4, (1, action_dim), jnp.float32, -bound2, bound2)
    return w1, b1, w2, b2


if __name__ == "__main__":
    # Small CartPole-like shapes: state_dim=4, hidden_dim=32, action_dim=2, batch=8
    batch, state_dim, hidden_dim, action_dim = 8, 4, 32, 2

    key = jax.random.PRNGKey(0)
    k_x, k_p = jax.random.split(key)
    s = jax.random.normal(k_x, (batch, state_dim), jnp.float32)
    w1, b1, w2, b2 = init_params(k_p, state_dim, hidden_dim, action_dim)

    out = policy_net_forward(s, w1, b1, w2, b2)
    out = jax.block_until_ready(out)

    # Sanity check against a pure-JAX reference of the same forward pass.
    h_ref = jnp.maximum(s @ w1 + b1, 0.0)
    logits_ref = h_ref @ w2 + b2
    ref = jax.nn.softmax(logits_ref, axis=1)
    assert out.shape == (batch, action_dim)
    assert jnp.allclose(out, ref, atol=1e-5, rtol=1e-5)
    assert jnp.allclose(jnp.sum(out, axis=1), 1.0, atol=1e-5)

    print("KERNEL_OK")
</pallas_src>

<mosaic_0001>
module attributes {stable_mosaic.version = 11 : i64} {
  func.func @policy_net_kernel(%arg0: i32, %arg1: memref<8x4xf32, #tpu.memory_space<vmem>>, %arg2: memref<152x128xf32, #tpu.memory_space<vmem>>, %arg3: memref<8x128xf32, #tpu.memory_space<vmem>>) attributes {dimension_semantics = [#tpu.dimension_semantics<parallel>], iteration_bounds = array<i64: 1>, scalar_prefetch = 0 : i64, scratch_operands = 0 : i64, tpu.core_type = #tpu.core_type<tc>, window_params = [{transform_indices = @transform_0, window_bounds = array<i64: 8, 4>}, {pipeline_mode = #tpu.pipeline_mode<synchronous>, transform_indices = @transform_1, window_bounds = array<i64: 152, 128>}, {transform_indices = @transform_2, window_bounds = array<i64: 8, 128>}]} {
    %c0 = arith.constant 0 : index
    %c0_0 = arith.constant 0 : index
    %0 = vector.load %arg1[%c0, %c0_0] : memref<8x4xf32, #tpu.memory_space<vmem>>, vector<8x4xf32>
    %c0_1 = arith.constant 0 : index
    %c0_2 = arith.constant 0 : index
    %1 = vector.load %arg2[%c0_1, %c0_2] : memref<152x128xf32, #tpu.memory_space<vmem>>, vector<4x128xf32>
    %cst = arith.constant dense<0.000000e+00> : vector<8x128xf32>
    %2 = tpu.matmul %0, %1, %cst {dimension_numbers = #tpu.dot_dimension_numbers<[1], [0], [0], [1], [0, 0, 1, 1], [], []>} : vector<8x4xf32>, vector<4x128xf32>, vector<8x128xf32> -> vector<8x128xf32>
    %c8 = arith.constant 8 : index
    %c0_3 = arith.constant 0 : index
    %3 = vector.load %arg2[%c8, %c0_3] : memref<152x128xf32, #tpu.memory_space<vmem>>, vector<1x128xf32>
    %4 = vector.broadcast %3 : vector<1x128xf32> to vector<8x128xf32>
    %5 = arith.addf %2, %4 : vector<8x128xf32>
    %cst_4 = arith.constant 0.000000e+00 : f32
    %6 = vector.broadcast %cst_4 : f32 to vector<8x128xf32>
    %7 = arith.maximumf %5, %6 : vector<8x128xf32>
    %c16 = arith.constant 16 : index
    %c0_5 = arith.constant 0 : index
    %8 = vector.load %arg2[%c16, %c0_5] : memref<152x128xf32, #tpu.memory_space<vmem>>, vector<128x128xf32>
    %cst_6 = arith.constant dense<0.000000e+00> : vector<8x128xf32>
    %9 = tpu.matmul %7, %8, %cst_6 {dimension_numbers = #tpu.dot_dimension_numbers<[1], [0], [0], [1], [0, 0, 1, 1], [], []>} : vector<8x128xf32>, vector<128x128xf32>, vector<8x128xf32> -> vector<8x128xf32>
    %c144 = arith.constant 144 : index
    %c0_7 = arith.constant 0 : index
    %10 = vector.load %arg2[%c144, %c0_7] : memref<152x128xf32, #tpu.memory_space<vmem>>, vector<1x128xf32>
    %11 = vector.broadcast %10 : vector<1x128xf32> to vector<8x128xf32>
    %12 = arith.addf %9, %11 : vector<8x128xf32>
    %cst_8 = arith.constant dense<0xFF800000> : vector<8xf32>
    %13 = vector.multi_reduction <maximumf>, %12, %cst_8 [1] : vector<8x128xf32> to vector<8xf32>
    %14 = vector.shape_cast %13 : vector<8xf32> to vector<8x1xf32>
    %15 = vector.broadcast %14 : vector<8x1xf32> to vector<8x128xf32>
    %16 = arith.subf %12, %15 : vector<8x128xf32>
    %17 = math.exp %16 : vector<8x128xf32>
    %cst_9 = arith.constant dense<0.000000e+00> : vector<8xf32>
    %18 = vector.multi_reduction <add>, %17, %cst_9 [1] : vector<8x128xf32> to vector<8xf32>
    %19 = vector.shape_cast %18 : vector<8xf32> to vector<8x1xf32>
    %20 = vector.broadcast %19 : vector<8x1xf32> to vector<8x128xf32>
    %21 = arith.divf %17, %20 : vector<8x128xf32>
    %c0_10 = arith.constant 0 : index
    %c0_11 = arith.constant 0 : index
    %22 = vector.load %arg3[%c0_10, %c0_11] : memref<8x128xf32, #tpu.memory_space<vmem>>, vector<8x128xf32>
    tpu.vector_store %arg3[%c0_10, %c0_11], %21 {strides = array<i32>} : memref<8x128xf32, #tpu.memory_space<vmem>>, vector<8x128xf32>,
    return
  }
  func.func @transform_0(%arg0: i32) -> (i32, i32) {
    %c0_i32 = arith.constant 0 : i32
    %c0_i32_0 = arith.constant 0 : i32
    return %arg0, %c0_i32 : i32, i32
  }
  func.func @transform_1(%arg0: i32) -> (i32, i32) {
    %c0_i32 = arith.constant 0 : i32
    %c0_i32_0 = arith.constant 0 : i32
    %c0_i32_1 = arith.constant 0 : i32
    return %c0_i32, %c0_i32_0 : i32, i32
  }
  func.func @transform_2(%arg0: i32) -> (i32, i32) {
    %c0_i32 = arith.constant 0 : i32
    %c0_i32_0 = arith.constant 0 : i32
    return %arg0, %c0_i32 : i32, i32
  }
}

</mosaic_0001>

<bundles_post_ra>
// kernel: policy_net_forward.1
= control target key start
LH: loop header
LB: loop body
LE: loop exit
PB: predicated region body
PF: predicated region fallthrough
CT: control target
= control target key end

     0   :  { %vm22_vm0 = vcmask 1043456   ;;  %vm18_vm1 = vcmask 31744   ;;  %v296_v0 = vmov 0.0   ;;  %vm297_vm2 = vmmov 0   ;;  %s377_s1 = inlined_call_operand.vmem [shape: f32[152,128], index: 1, kind: input, shape index: {}]   ;;  %s378_s0 = inlined_call_operand.vmem [shape: f32[8,4], index: 0, kind: input, shape index: {}]   ;;  %s379_s2 = inlined_call_operand.vmem [shape: f32[8,128], index: 2, kind: output, shape index: {}]  }
   0x1   :  { %225 = vmatprep.subr.mxu0 %v296_v0  ;;  %v12_v1 = vld [vmem:[%s377_s1] sm:$0xf]  ;;  %227 = vmatprep.mubr.msk.f32.mxu0 %vm297_vm2, %v296_v0  ;;  %v97_v3 = vld [vmem:[%s377_s1 + $0x10] sm:$0xff]  ;;  %v298_v4 = vmov 0.0|0.0   ;;  %v98_v5 = vld [vmem:[%s377_s1 + $0x18] sm:$0xff] }
   0x2   :  { %v11_v2 = vld [vmem:[%s378_s0] sm:$0xff]  ;;  %226 = vmatpush3.msk.msra.mxu0 %vm22_vm0, %v12_v1  ;;  %265 = vmatprep.subr.bf16.mxu1 %v298_v4  ;;  %v100_v7 = vld [vmem:[%s377_s1 + $0x28] sm:$0xff]  ;;  %v266_v8 = vpack.c.bf16 %v98_v5, %v97_v3  ;;  %v101_v10 = vld [vmem:[%s377_s1 + $0x30] sm:$0xff] }
   0x3   :  { %v99_v6 = vld [vmem:[%s377_s1 + $0x20] sm:$0xff]  ;;  %228 = vmatmul.mubr.msk.f32.vlgmr.msra.gmra.mrb[0].mxu0 %vm18_vm1, %v11_v2  ;;  %262 = vmatprep.mubr.msk.f32.mxu1 %vm297_vm2, %v296_v0  ;;  %v102_v11 = vld [vmem:[%s377_s1 + $0x38] sm:$0xff]  ;;  %v104_v14 = vld [vmem:[%s377_s1 + $0x48] sm:$0xff] }
   0x4   :  { %267 = vmatpush3.bf16.msra.mxu1 %v266_v8  ;;  %v269_v9 = vpack.c.bf16 %v100_v7, %v99_v6  ;;  %v272_v12 = vpack.c.bf16 %v102_v11, %v101_v10  ;;  %v103_v13 = vld [vmem:[%s377_s1 + $0x40] sm:$0xff]  ;;  %v105_v16 = vld [vmem:[%s377_s1 + $0x50] sm:$0xff]  ;;  %v106_v17 = vld [vmem:[%s377_s1 + $0x58] sm:$0xff] }
   0x5   :  { %268 = vmatprep.subr.bf16.mxu1 %v298_v4  ;;  %v275_v15 = vpack.c.bf16 %v104_v14, %v103_v13  ;;  %v278_v18 = vpack.c.bf16 %v106_v17, %v105_v16  ;;  %v107_v19 = vld [vmem:[%s377_s1 + $0x60] sm:$0xff]  ;;  %v108_v20 = vld [vmem:[%s377_s1 + $0x68] sm:$0xff]  ;;  %v109_v22 = vld [vmem:[%s377_s1 + $0x70] sm:$0xff] }
   0x6   :  { %v281_v21 = vpack.c.bf16 %v108_v20, %v107_v19  ;;  %v110_v23 = vld [vmem:[%s377_s1 + $0x78] sm:$0xff]  ;;  %v111_v25 = vld [vmem:[%s377_s1 + $0x80] sm:$0xff]  ;;  %v112_v26 = vld [vmem:[%s377_s1 + $0x88] sm:$0xff] }
   0x7   :  { %v284_v24 = vpack.c.bf16 %v110_v23, %v109_v22  ;;  %v287_v27 = vpack.c.bf16 %v112_v26, %v111_v25  ;;  %v202_v28 = vld [vmem:[%s377_s1 + $0x8] ss:$0 sm:$0xff]  ;;  %v205_v33 = vld [vmem:[%s377_s1 + $0x90] ss:$0 sm:$0xff] }
   0x8   :  { %270 = vmatpush3.bf16.msra.mxu1 %v269_v9 }
   0x9   :  { %271 = vmatprep.subr.bf16.mxu1 %v298_v4 }
   0xc   :  { %273 = vmatpush3.bf16.msra.mxu1 %v272_v12 }
   0xd   :  { %274 = vmatprep.subr.bf16.mxu1 %v298_v4 }
  0x10   :  { %276 = vmatpush3.bf16.msra.mxu1 %v275_v15 }
  0x11   :  { %277 = vmatprep.subr.bf16.mxu1 %v298_v4 }
  0x14   :  { %279 = vmatpush3.bf16.msra.mxu1 %v278_v18 }
  0x15   :  { %280 = vmatprep.subr.bf16.mxu1 %v298_v4 }
  0x18   :  { %282 = vmatpush3.bf16.msra.mxu1 %v281_v21 }
  0x19   :  { %283 = vmatprep.subr.bf16.mxu1 %v298_v4 }
  0x1c   :  { %285 = vmatpush3.bf16.msra.mxu1 %v284_v24 }
  0x1d   :  { %286 = vmatprep.subr.bf16.mxu1 %v298_v4 }
  0x20   :  { %288 = vmatpush3.bf16.msra.mxu1 %v287_v27 }
  0xd6   :  { %v92_v29 = vpop.f32.mrb[0].mxu0 }
  0xd7   :  { %v93_v30 = vadd.f32 %v202_v28, %v92_v29  ;;  %v229_v31 = vpop.f32.mrb[1].mxu0 }
  0xd9   :  { %v96_v32 = vmax.f32 %v93_v30, 0.0 }
  0xdb   :  { %263 = vmatmul.mubr.f32.vlgmr.msra.gmra.mrb[0].mxu1 %v96_v32 }
 0x1ae   :  { %v184_v34 = vpop.f32.mrb[0].mxu1 }
 0x1af   :  { %v185_v35 = vadd.f32 %v205_v33, %v184_v34  ;;  %v264_v36 = vpop.f32.mrb[1].mxu1 }
 0x1b1   :  { %188 = vmax.xlane.f32.xlu0 %v185_v35 }
 0x23e   :  { %v189_v37 = vpop.xlane.xlu0 %188 }
 0x23f   :  { %v190_v38 = vsub.f32 %v185_v35, %v189_v37 }
 0x241   :  { %v191_v39 = vmul.f32 1.442695, %v190_v38 }
 0x243   :  { %292 = vpow2.f32 %v191_v39 }
 0x24d   :  { %v293_v40 = vpop.eup %292 }
 0x24e   :  { %193 = vadd.xlane.f32.xlu0 %v293_v40 }
 0x2db   :  { %v194_v41 = vpop.xlane.xlu0 %193 }
 0x2dc   :  { %294 = vrcp.f32 %v194_v41 }
 0x2e6   :  { %v295_v42 = vpop.eup %294 }
 0x2e7   :  { %v196_v43 = vmul.f32 %v295_v42, %v293_v40 }
 0x2e9   :  { %197 = vst [vmem:[%s379_s2] sm:$0xff] %v196_v43 }

</bundles_post_ra>
